<compile_context>
chip_gen: v7x
topology: tpu7x:2x2x1
jax: 0.10.0
libtpu: 0.0.40
codegen_flags: <defaults>
</compile_context>

<pallas_src>
import jax
import jax.numpy as jnp
from jax.experimental import pallas as pl
from jax.experimental.pallas import tpu as pltpu

LEAKY_SLOPE = 0.01     # torch.nn.LeakyReLU default
LN_EPS = 1e-5          # torch.nn.LayerNorm default


def _leaky_relu(x):
    return jnp.where(x > 0, x, LEAKY_SLOPE * x)


def _round_up(n, m):
    return ((n + m - 1) // m) * m


# ---------------------------------------------------------------------------
# Weight-slab layout (single packed (rows, 2H) f32 array, 8-row aligned blocks)
# ---------------------------------------------------------------------------
def _slab_layout(state_size, hidden_size, action_size):
    S, H, A = state_size, hidden_size, action_size
    lanes = 2 * H
    assert 1 + A <= lanes and H <= lanes, "layout assumes 1+A <= 2H"
    s_pad = _round_up(S, 8)
    off = {
        "w1":   0,                      # (S, H)
        "b1":   s_pad,                  # rows: b1, lnw, lnb (+ zero pad to 8)
        "w2":   s_pad + 8,              # (H, H)
        "b2":   s_pad + 8 + H,          # (1, H)  (+ zero pad to 8)
        "wva1": s_pad + 16 + H,         # (H, 2H)   fused [vw1 | aw1]
        "bva1": s_pad + 16 + 2 * H,     # (1, 2H)   fused [vb1 | ab1]
        "wva2": s_pad + 24 + 2 * H,     # (2H, 1+A) block-diag [vw2 ; aw2]
        "bva2": s_pad + 24 + 4 * H,     # (1, 1+A)  fused [vb2 | ab2]
    }
    rows = s_pad + 32 + 4 * H
    return off, rows, lanes


def pack_params(p, state_size, hidden_size, action_size):
    """Pack all layer weights/biases into one lane-aligned slab (done once)."""
    S, H, A = state_size, hidden_size, action_size
    off, rows, lanes = _slab_layout(S, H, A)
    slab = jnp.zeros((rows, lanes), jnp.float32)

    def put(sl, r, x):
        return sl.at[r:r + x.shape[0], :x.shape[1]].set(x)

    slab = put(slab, off["w1"], p["w1"])
    slab = put(slab, off["b1"], p["b1"])
    slab = put(slab, off["b1"] + 1, p["lnw"])
    slab = put(slab, off["b1"] + 2, p["lnb"])
    slab = put(slab, off["w2"], p["w2"])
    slab = put(slab, off["b2"], p["b2"])

    # Fused value/advantage first layer: one (H, 2H) matmul.
    wva1 = jnp.concatenate([p["vw1"], p["aw1"]], axis=1)
    bva1 = jnp.concatenate([p["vb1"], p["ab1"]], axis=1)
    slab = put(slab, off["wva1"], wva1)
    slab = put(slab, off["bva1"], bva1)

    # Fused second layer, block diagonal -> one (2H, 1+A) matmul.
    wva2 = jnp.zeros((2 * H, 1 + A), jnp.float32)
    wva2 = wva2.at[:H, 0:1].set(p["vw2"])
    wva2 = wva2.at[H:, 1:].set(p["aw2"])
    bva2 = jnp.concatenate([p["vb2"], p["ab2"]], axis=1)
    slab = put(slab, off["wva2"], wva2)
    slab = put(slab, off["bva2"], bva2)
    return slab


# ---------------------------------------------------------------------------
# Kernel
# ---------------------------------------------------------------------------
def _make_kernel(batch, state_size, hidden_size, action_size, off):
    B, S, H, A = batch, state_size, hidden_size, action_size
    inv_h = 1.0 / H
    inv_ba = 1.0 / (B * A)

    def kernel(s_ref, w_ref, q_ref):
        s = s_ref[...]                                               # (B, S)

        # Static slices of the packed slab (zero-cost views).
        w1   = w_ref[off["w1"]:off["w1"] + S, 0:H]
        b1   = w_ref[off["b1"]:off["b1"] + 1, 0:H]
        lnw  = w_ref[off["b1"] + 1:off["b1"] + 2, 0:H]
        lnb  = w_ref[off["b1"] + 2:off["b1"] + 3, 0:H]
        w2   = w_ref[off["w2"]:off["w2"] + H, 0:H]
        b2   = w_ref[off["b2"]:off["b2"] + 1, 0:H]
        wva1 = w_ref[off["wva1"]:off["wva1"] + H, :]
        bva1 = w_ref[off["bva1"]:off["bva1"] + 1, :]
        wva2 = w_ref[off["wva2"]:off["wva2"] + 2 * H, 0:1 + A]
        bva2 = w_ref[off["bva2"]:off["bva2"] + 1, 0:1 + A]

        # ---- feature trunk: Linear -> LayerNorm -> LeakyReLU -> Linear ----
        h = jnp.dot(s, w1, preferred_element_type=jnp.float32) + b1
        mu = jnp.sum(h, axis=-1, keepdims=True) * inv_h
        d = h - mu
        var = jnp.sum(d * d, axis=-1, keepdims=True) * inv_h
        h = d * jax.lax.rsqrt(var + LN_EPS)
        h = _leaky_relu(h * lnw + lnb)
        feats = jnp.dot(h, w2, preferred_element_type=jnp.float32) + b2

        # ---- fused value + advantage heads (2 matmuls instead of 4) ----
        va = _leaky_relu(
            jnp.dot(feats, wva1, preferred_element_type=jnp.float32) + bva1)
        va = _leaky_relu(
            jnp.dot(va, wva2, preferred_element_type=jnp.float32) + bva2)
        v = va[:, 0:1]                                               # (B, 1)
        a = va[:, 1:1 + A]                                           # (B, A)

        # Dueling combine: GLOBAL mean over batch and actions (as in source).
        a_mean = jnp.sum(a) * inv_ba
        q_ref[...] = v + (a - a_mean)

    return kernel


def dueling_dqn_forward(s, slab, state_size, hidden_size, action_size):
    B = s.shape[0]
    S, H, A = state_size, hidden_size, action_size
    off, rows, lanes = _slab_layout(S, H, A)
    kernel = _make_kernel(B, S, H, A, off)

    flops = 2 * B * (S * H + H * H + H * (2 * H) + (2 * H) * (1 + A))
    bytes_accessed = 4 * (B * S + rows * lanes + B * A)
    vmem = pl.BlockSpec(memory_space=pltpu.MemorySpace.VMEM)

    return pl.pallas_call(
        kernel,
        out_shape=jax.ShapeDtypeStruct((B, A), jnp.float32),
        in_specs=[vmem, vmem],
        out_specs=vmem,
        cost_estimate=pl.CostEstimate(
            flops=flops, transcendentals=B, bytes_accessed=bytes_accessed),
    )(s, slab)


# ---------------------------------------------------------------------------
# Parameter init (PyTorch-like), pure-JAX reference, and self-test
# ---------------------------------------------------------------------------
def init_params(key, state_size, action_size, hidden_size):
    ks = jax.random.split(key, 12)

    def lin(kw, kb, fan_in, fan_out):
        bound = 1.0 / jnp.sqrt(fan_in)
        w = jax.random.uniform(kw, (fan_in, fan_out), jnp.float32, -bound, bound)
        b = jax.random.uniform(kb, (1, fan_out), jnp.float32, -bound, bound)
        return w, b

    w1, b1 = lin(ks[0], ks[1], state_size, hidden_size)
    w2, b2 = lin(ks[2], ks[3], hidden_size, hidden_size)
    vw1, vb1 = lin(ks[4], ks[5], hidden_size, hidden_size)
    vw2, vb2 = lin(ks[6], ks[7], hidden_size, 1)
    aw1, ab1 = lin(ks[8], ks[9], hidden_size, hidden_size)
    aw2, ab2 = lin(ks[10], ks[11], hidden_size, action_size)
    lnw = jnp.ones((1, hidden_size), jnp.float32)
    lnb = jnp.zeros((1, hidden_size), jnp.float32)
    return dict(
        w1=w1, b1=b1, lnw=lnw, lnb=lnb, w2=w2, b2=b2,
        vw1=vw1, vb1=vb1, vw2=vw2, vb2=vb2,
        aw1=aw1, ab1=ab1, aw2=aw2, ab2=ab2,
    )


def reference_forward(s, p):
    h = s @ p["w1"] + p["b1"]
    mu = h.mean(-1, keepdims=True)
    var = ((h - mu) ** 2).mean(-1, keepdims=True)
    h = (h - mu) / jnp.sqrt(var + LN_EPS) * p["lnw"] + p["lnb"]
    h = jnp.where(h > 0, h, LEAKY_SLOPE * h)
    f = h @ p["w2"] + p["b2"]

    v = f @ p["vw1"] + p["vb1"]
    v = jnp.where(v > 0, v, LEAKY_SLOPE * v)
    v = v @ p["vw2"] + p["vb2"]
    v = jnp.where(v > 0, v, LEAKY_SLOPE * v)

    a = f @ p["aw1"] + p["ab1"]
    a = jnp.where(a > 0, a, LEAKY_SLOPE * a)
    a = a @ p["aw2"] + p["ab2"]
    a = jnp.where(a > 0, a, LEAKY_SLOPE * a)

    return v + (a - a.mean())


if __name__ == "__main__":
    # Small shapes consistent with a LunarLander-style Dueling DQN.
    batch, state_size, action_size, hidden_size = 8, 8, 4, 32

    key = jax.random.PRNGKey(0)
    k_s, k_p = jax.random.split(key)
    s = jax.random.normal(k_s, (batch, state_size), jnp.float32)
    params = init_params(k_p, state_size, action_size, hidden_size)

    # Pack weights once (init-time); the kernel then sees only 2 operands.
    slab = pack_params(params, state_size, hidden_size, action_size)

    q = dueling_dqn_forward(s, slab, state_size, hidden_size, action_size)
    jax.block_until_ready(q)

    q_ref = reference_forward(s, params)
    assert q.shape == (batch, action_size)
    assert jnp.allclose(q, q_ref, atol=1e-5, rtol=1e-5), (q, q_ref)

    print("KERNEL_OK")
</pallas_src>

<mosaic_0001>
module attributes {stable_mosaic.version = 11 : i64} {
  func.func @kernel(%arg0: memref<8x8xf32, #tpu.memory_space<vmem>>, %arg1: memref<168x64xf32, #tpu.memory_space<vmem>>, %arg2: memref<8x4xf32, #tpu.memory_space<vmem>>) attributes {dimension_semantics = [], scalar_prefetch = 0 : i64, scratch_operands = 0 : i64, tpu.core_type = #tpu.core_type<tc>} {
    %c0 = arith.constant 0 : index
    %c0_0 = arith.constant 0 : index
    %0 = vector.load %arg0[%c0, %c0_0] : memref<8x8xf32, #tpu.memory_space<vmem>>, vector<8x8xf32>
    %c0_1 = arith.constant 0 : index
    %c0_2 = arith.constant 0 : index
    %1 = vector.load %arg1[%c0_1, %c0_2] : memref<168x64xf32, #tpu.memory_space<vmem>>, vector<8x32xf32>
    %c8 = arith.constant 8 : index
    %c0_3 = arith.constant 0 : index
    %2 = vector.load %arg1[%c8, %c0_3] : memref<168x64xf32, #tpu.memory_space<vmem>>, vector<1x32xf32>
    %c9 = arith.constant 9 : index
    %c0_4 = arith.constant 0 : index
    %3 = vector.load %arg1[%c9, %c0_4] : memref<168x64xf32, #tpu.memory_space<vmem>>, vector<1x32xf32>
    %c10 = arith.constant 10 : index
    %c0_5 = arith.constant 0 : index
    %4 = vector.load %arg1[%c10, %c0_5] : memref<168x64xf32, #tpu.memory_space<vmem>>, vector<1x32xf32>
    %c16 = arith.constant 16 : index
    %c0_6 = arith.constant 0 : index
    %5 = vector.load %arg1[%c16, %c0_6] : memref<168x64xf32, #tpu.memory_space<vmem>>, vector<32x32xf32>
    %c48 = arith.constant 48 : index
    %c0_7 = arith.constant 0 : index
    %6 = vector.load %arg1[%c48, %c0_7] : memref<168x64xf32, #tpu.memory_space<vmem>>, vector<1x32xf32>
    %c56 = arith.constant 56 : index
    %c0_8 = arith.constant 0 : index
    %7 = vector.load %arg1[%c56, %c0_8] : memref<168x64xf32, #tpu.memory_space<vmem>>, vector<32x64xf32>
    %c88 = arith.constant 88 : index
    %c0_9 = arith.constant 0 : index
    %8 = vector.load %arg1[%c88, %c0_9] : memref<168x64xf32, #tpu.memory_space<vmem>>, vector<1x64xf32>
    %c96 = arith.constant 96 : index
    %c0_10 = arith.constant 0 : index
    %9 = vector.load %arg1[%c96, %c0_10] : memref<168x64xf32, #tpu.memory_space<vmem>>, vector<64x5xf32>
    %c160 = arith.constant 160 : index
    %c0_11 = arith.constant 0 : index
    %10 = vector.load %arg1[%c160, %c0_11] : memref<168x64xf32, #tpu.memory_space<vmem>>, vector<1x5xf32>
    %cst = arith.constant dense<0.000000e+00> : vector<8x32xf32>
    %11 = tpu.matmul %0, %1, %cst {dimension_numbers = #tpu.dot_dimension_numbers<[1], [0], [0], [1], [0, 0, 1, 1], [], []>} : vector<8x8xf32>, vector<8x32xf32>, vector<8x32xf32> -> vector<8x32xf32>
    %12 = vector.broadcast %2 : vector<1x32xf32> to vector<8x32xf32>
    %13 = arith.addf %11, %12 : vector<8x32xf32>
    %cst_12 = arith.constant dense<0.000000e+00> : vector<8xf32>
    %14 = vector.multi_reduction <add>, %13, %cst_12 [1] : vector<8x32xf32> to vector<8xf32>
    %15 = vector.shape_cast %14 : vector<8xf32> to vector<8x1xf32>
    %cst_13 = arith.constant 3.125000e-02 : f32
    %16 = vector.broadcast %cst_13 : f32 to vector<8x1xf32>
    %17 = arith.mulf %15, %16 : vector<8x1xf32>
    %18 = vector.broadcast %17 : vector<8x1xf32> to vector<8x32xf32>
    %19 = arith.subf %13, %18 : vector<8x32xf32>
    %20 = arith.mulf %19, %19 : vector<8x32xf32>
    %cst_14 = arith.constant dense<0.000000e+00> : vector<8xf32>
    %21 = vector.multi_reduction <add>, %20, %cst_14 [1] : vector<8x32xf32> to vector<8xf32>
    %22 = vector.shape_cast %21 : vector<8xf32> to vector<8x1xf32>
    %cst_15 = arith.constant 3.125000e-02 : f32
    %23 = vector.broadcast %cst_15 : f32 to vector<8x1xf32>
    %24 = arith.mulf %22, %23 : vector<8x1xf32>
    %cst_16 = arith.constant 9.99999974E-6 : f32
    %25 = vector.broadcast %cst_16 : f32 to vector<8x1xf32>
    %26 = arith.addf %24, %25 : vector<8x1xf32>
    %27 = math.rsqrt %26 : vector<8x1xf32>
    %28 = vector.broadcast %27 : vector<8x1xf32> to vector<8x32xf32>
    %29 = arith.mulf %19, %28 : vector<8x32xf32>
    %30 = vector.broadcast %3 : vector<1x32xf32> to vector<8x32xf32>
    %31 = arith.mulf %29, %30 : vector<8x32xf32>
    %32 = vector.broadcast %4 : vector<1x32xf32> to vector<8x32xf32>
    %33 = arith.addf %31, %32 : vector<8x32xf32>
    %cst_17 = arith.constant 0.000000e+00 : f32
    %34 = vector.broadcast %cst_17 : f32 to vector<8x32xf32>
    %35 = arith.cmpf ogt, %33, %34 : vector<8x32xf32>
    %cst_18 = arith.constant 0.00999999977 : f32
    %36 = vector.broadcast %cst_18 : f32 to vector<8x32xf32>
    %37 = arith.mulf %36, %33 : vector<8x32xf32>
    %38 = arith.select %35, %33, %37 : vector<8x32xi1>, vector<8x32xf32>
    %cst_19 = arith.constant dense<0.000000e+00> : vector<8x32xf32>
    %39 = tpu.matmul %38, %5, %cst_19 {dimension_numbers = #tpu.dot_dimension_numbers<[1], [0], [0], [1], [0, 0, 1, 1], [], []>} : vector<8x32xf32>, vector<32x32xf32>, vector<8x32xf32> -> vector<8x32xf32>
    %40 = vector.broadcast %6 : vector<1x32xf32> to vector<8x32xf32>
    %41 = arith.addf %39, %40 : vector<8x32xf32>
    %cst_20 = arith.constant dense<0.000000e+00> : vector<8x64xf32>
    %42 = tpu.matmul %41, %7, %cst_20 {dimension_numbers = #tpu.dot_dimension_numbers<[1], [0], [0], [1], [0, 0, 1, 1], [], []>} : vector<8x32xf32>, vector<32x64xf32>, vector<8x64xf32> -> vector<8x64xf32>
    %43 = vector.broadcast %8 : vector<1x64xf32> to vector<8x64xf32>
    %44 = arith.addf %42, %43 : vector<8x64xf32>
    %cst_21 = arith.constant 0.000000e+00 : f32
    %45 = vector.broadcast %cst_21 : f32 to vector<8x64xf32>
    %46 = arith.cmpf ogt, %44, %45 : vector<8x64xf32>
    %cst_22 = arith.constant 0.00999999977 : f32
    %47 = vector.broadcast %cst_22 : f32 to vector<8x64xf32>
    %48 = arith.mulf %47, %44 : vector<8x64xf32>
    %49 = arith.select %46, %44, %48 : vector<8x64xi1>, vector<8x64xf32>
    %cst_23 = arith.constant dense<0.000000e+00> : vector<8x5xf32>
    %50 = tpu.matmul %49, %9, %cst_23 {dimension_numbers = #tpu.dot_dimension_numbers<[1], [0], [0], [1], [0, 0, 1, 1], [], []>} : vector<8x64xf32>, vector<64x5xf32>, vector<8x5xf32> -> vector<8x5xf32>
    %51 = vector.broadcast %10 : vector<1x5xf32> to vector<8x5xf32>
    %52 = arith.addf %50, %51 : vector<8x5xf32>
    %cst_24 = arith.constant 0.000000e+00 : f32
    %53 = vector.broadcast %cst_24 : f32 to vector<8x5xf32>
    %54 = arith.cmpf ogt, %52, %53 : vector<8x5xf32>
    %cst_25 = arith.constant 0.00999999977 : f32
    %55 = vector.broadcast %cst_25 : f32 to vector<8x5xf32>
    %56 = arith.mulf %55, %52 : vector<8x5xf32>
    %57 = arith.select %54, %52, %56 : vector<8x5xi1>, vector<8x5xf32>
    %58 = vector.extract_strided_slice %57 {offsets = [0, 0], sizes = [8, 1], strides = [1, 1]} : vector<8x5xf32> to vector<8x1xf32>
    %59 = vector.extract_strided_slice %57 {offsets = [0, 1], sizes = [8, 4], strides = [1, 1]} : vector<8x5xf32> to vector<8x4xf32>
    %60 = vector.shape_cast %59 : vector<8x4xf32> to vector<1x8x4xf32>
    %cst_26 = arith.constant dense<0.000000e+00> : vector<1xf32>
    %61 = vector.multi_reduction <add>, %60, %cst_26 [1, 2] : vector<1x8x4xf32> to vector<1xf32>
    %62 = vector.shape_cast %61 : vector<1xf32> to vector<1x1x1xf32>
    %63 = vector.extract %62[0, 0, 0] : f32 from vector<1x1x1xf32>
    %cst_27 = arith.constant 3.125000e-02 : f32
    %64 = arith.mulf %63, %cst_27 : f32
    %65 = vector.broadcast %64 : f32 to vector<8x4xf32>
    %66 = arith.subf %59, %65 : vector<8x4xf32>
    %67 = vector.broadcast %58 : vector<8x1xf32> to vector<8x4xf32>
    %68 = arith.addf %67, %66 : vector<8x4xf32>
    %c0_28 = arith.constant 0 : index
    %c0_29 = arith.constant 0 : index
    %69 = vector.load %arg2[%c0_28, %c0_29] : memref<8x4xf32, #tpu.memory_space<vmem>>, vector<8x4xf32>
    tpu.vector_store %arg2[%c0_28, %c0_29], %68 {strides = array<i32>} : memref<8x4xf32, #tpu.memory_space<vmem>>, vector<8x4xf32>,
    return
  }
}

</mosaic_0001>

<bundles_post_ra>
// kernel: tpu_custom_call.1
= control target key start
LH: loop header
LB: loop body
LE: loop exit
PB: predicated region body
PF: predicated region fallthrough
CT: control target
= control target key end

     0   :  { %vm39_vm0 = vcmask 64512   ;;  %v521_v0 = vmov 0.0   ;;  %vm522_vm1 = vmmov 0   ;;  %vm113_vm2 = vcmask 261120   ;;  %s525_s27 = smov 127   ;;  %s626_s1 = inlined_call_operand.vmem [shape: f32[168,64], index: 1, kind: input, shape index: {}]   ;;  %s627_s0 = inlined_call_operand.vmem [shape: f32[8,8], index: 0, kind: input, shape index: {}]   ;;  %s628_s2 = inlined_call_operand.vmem [shape: f32[8,4], index: 2, kind: output, shape index: {}]  }
   0x1   :  { %441 = vmatprep.subr.mxu0 %v521_v0  ;;  %v12_v1 = vld [vmem:[%s626_s1] sm:$0xff]  ;;  %443 = vmatprep.mubr.msk.f32.mxu0 %vm522_vm1, %v521_v0  ;;  %v410_v3 = vld [vmem:[%s626_s1 + $0x8] ss:$0 sm:$0xff]  ;;  %v16_v13 = vld [vmem:[%s626_s1 + $0x10] sm:$0xff]  ;;  %v523_v18 = vmov 0.0|0.0   ;;  %vm301_vm5 = vcmask 523264  }
   0x2   :  { %v11_v2 = vld [vmem:[%s627_s0] sm:$0xff]  ;;  %442 = vmatpush3.msra.mxu0 %v12_v1  ;;  %484 = vmatprep.mubr.msk.f32.mxu1 %vm522_vm1, %v521_v0  ;;  %v17_v14 = vld [vmem:[%s626_s1 + $0x18] sm:$0xff]  ;;  %v19_v17 = vld [vmem:[%s626_s1 + $0x28] sm:$0xff]  ;;  %v524_v59 = vmov 0   ;;  %vm382_vm7 = vcmask 31744  }
   0x3   :  { %444 = vmatmul.mubr.msk.f32.vlgmr.msra.gmra.mrb[0].mxu0 %vm39_vm0, %v11_v2  ;;  %v488_v15 = vpack.c.bf16 %v17_v14, %v16_v13  ;;  %v18_v16 = vld [vmem:[%s626_s1 + $0x20] sm:$0xff]  ;;  %487 = vmatprep.subr.bf16.mxu0 %v523_v18  ;;  %v412_v24 = vld [vmem:[%s626_s1 + $0x9] ss:$0 sm:$0xff]  ;;  %v413_v26 = vld [vmem:[%s626_s1 + $0xa] ss:$0 sm:$0xff] }
   0x4   :  { %454 = vmatprep.mubr.msk.f32.mxu0 %vm522_vm1, %v521_v0  ;;  %499 = vmatprep.subr.bf16.mxu1 %v523_v18  ;;  %v491_v19 = vpack.c.bf16 %v19_v17, %v18_v16  ;;  %v21_v28 = vld [vmem:[%s626_s1 + $0x38] sm:$0xff]  ;;  %v22_v29 = vld [vmem:[%s626_s1 + $0x40] sm:$0xff]  ;;  %v23_v34 = vld [vmem:[%s626_s1 + $0x48] sm:$0xff] }
   0x5   :  { %489 = vmatpush3.bf16.msra.mxu0 %v488_v15  ;;  %v494_v32 = vpack.c.bf16 %v22_v29, %v21_v28  ;;  %v24_v35 = vld [vmem:[%s626_s1 + $0x50] sm:$0xff]  ;;  %v26_v37 = vld [vmem:[%s626_s1 + $0x60] sm:$0xff]  ;;  %v27_v38 = vld [vmem:[%s626_s1 + $0x68] sm:$0xff]  ;;  %518 = vset.pattern.permute.xlu0 %v524_v59 }
   0x6   :  { %490 = vmatprep.subr.bf16.mxu0 %v523_v18  ;;  %v497_v36 = vpack.c.bf16 %v24_v35, %v23_v34  ;;  %v28_v39 = vld [vmem:[%s626_s1 + $0x70] sm:$0xff]  ;;  %v500_v40 = vpack.c.bf16 %v27_v38, %v26_v37  ;;  %v29_v41 = vld [vmem:[%s626_s1 + $0x78] sm:$0xff]  ;;  %v30_v43 = vld [vmem:[%s626_s1 + $0x80] sm:$0xff] }
   0x7   :  { %v503_v42 = vpack.c.bf16 %v29_v41, %v28_v39  ;;  %v31_v44 = vld [vmem:[%s626_s1 + $0x88] sm:$0xff]  ;;  %v414_v46 = vld [vmem:[%s626_s1 + $0x30] ss:$0 sm:$0xff]  ;;  %v33_v51 = vld [vmem:[%s626_s1 + $0x98] sm:$0xff] }
   0x8   :  { %501 = vmatpush3.bf16.msra.mxu1 %v500_v40  ;;  %v506_v45 = vpack.c.bf16 %v31_v44, %v30_v43  ;;  %v32_v50 = vld [vmem:[%s626_s1 + $0x90] sm:$0xff]  ;;  %v416_v53 = vld [vmem:[%s626_s1 + $0x58] ss:$0 sm:$0xff]  ;;  %v418_v60 = vld [vmem:[%s626_s1 + $0xa0] ss:$0 sm:$0xff] }
   0x9   :  { %492 = vmatpush3.bf16.msra.mxu0 %v491_v19  ;;  %502 = vmatprep.subr.bf16.mxu1 %v523_v18  ;;  %v509_v52 = vpack.c.bf16 %v33_v51, %v32_v50 }
   0xa   :  { %493 = vmatprep.subr.bf16.mxu0 %v523_v18 }
   0xc   :  { %504 = vmatpush3.bf16.msra.mxu1 %v503_v42 }
   0xd   :  { %505 = vmatprep.subr.bf16.mxu1 %v523_v18 }
  0x10   :  { %507 = vmatpush3.bf16.msra.mxu1 %v506_v45 }
  0x11   :  { %508 = vmatprep.subr.bf16.mxu1 %v523_v18 }
  0x14   :  { %510 = vmatpush3.bf16.msra.mxu1 %v509_v52 }
  0xd6   :  { %v109_v4 = vpop.f32.mrb[0].mxu0 }
  0xd7   :  { %v110_v5 = vadd.f32 %v410_v3, %v109_v4  ;;  %v445_v6 = vpop.f32.mrb[1].mxu0 }
  0xd9   :  { %v114_v7 = vsel %vm113_vm2, %v110_v5, 0.0 }
  0xda   :  { %115 = vadd.xlane.f32.xlu0 %v114_v7 }
 0x167   :  { %v116_v8 = vpop.xlane.xlu0 %115 }
 0x168   :  { %v117_v9 = vmul.f32 0.03125, %v116_v8 }
 0x16a   :  { %v118_v10 = vsub.f32 %v110_v5, %v117_v9 }
 0x16c   :  { %v119_v11 = vmul.f32 %v118_v10, %v118_v10 }
 0x16e   :  { %v120_v12 = vsel %vm113_vm2, %v119_v11, 0.0 }
 0x16f   :  { %121 = vadd.xlane.f32.xlu0 %v120_v12 }
 0x1fc   :  { %v122_v20 = vpop.xlane.xlu0 %121 }
 0x1fd   :  { %v123_v21 = vmul.f32 0.03125, %v122_v20 }
 0x1ff   :  { %v124_v22 = vadd.f32 1e-05, %v123_v21 }
 0x201   :  { %519 = vrsqrt.f32 %v124_v22 }
 0x20b   :  { %v520_v23 = vpop.eup %519 }
 0x20c   :  { %v126_v25 = vmul.f32 %v520_v23, %v118_v10 }
 0x20e   :  { %v131_v27 = vmul.f32 %v412_v24, %v126_v25 }
 0x210   :  { %v136_v30 = vadd.f32 %v413_v26, %v131_v27 }
 0x212   :  { %vm137_vm3 = vcmp.gt.f32.partialorder %v136_v30, 0.0  ;;  %v138_v31 = vmul.f32 0.01, %v136_v30 }
 0x214   :  { %v139_v33 = vsel %vm137_vm3, %v136_v30, %v138_v31 }
 0x215   :  { %455 = vmatmul.mubr.msk.f32.vlgmr.msra.gmra.mrb[2].mxu0 %vm113_vm2, %v139_v33 }
 0x216   :  { %495 = vmatpush3.bf16.msra.mxu0 %v494_v32  ;;  %465 = vmatprep.mubr.msk.f32.mxu0 %vm522_vm1, %v521_v0 }
 0x217   :  { %496 = vmatprep.subr.bf16.mxu0 %v523_v18 }
 0x21a   :  { %498 = vmatpush3.bf16.msra.mxu0 %v497_v36 }
 0x2e8   :  { %v213_v47 = vpop.f32.mrb[2].mxu0 }
 0x2e9   :  { %v214_v48 = vadd.f32 %v414_v46, %v213_v47  ;;  %v456_v49 = vpop.f32.mrb[3].mxu0 }
 0x2eb   :  { %466 = vmatmul.mubr.msk.f32.vlgmr.msra.gmra.mrb[4].mxu0 %vm113_vm2, %v214_v48 }
 0x3be   :  { %v290_v54 = vpop.f32.mrb[4].mxu0 }
 0x3bf   :  { %v291_v55 = vadd.f32 %v416_v53, %v290_v54  ;;  %v467_v56 = vpop.f32.mrb[5].mxu0 }
 0x3c1   :  { %vm294_vm4 = vcmp.gt.f32.partialorder %v291_v55, 0.0  ;;  %v295_v57 = vmul.f32 0.01, %v291_v55 }
 0x3c3   :  { %v296_v58 = vsel %vm294_vm4, %v291_v55, %v295_v57 }
 0x3c4   :  { %485 = vmatmul.mubr.msk.f32.vlgmr.msra.gmra.mrb[0].mxu1 %vm301_vm5, %v296_v58 }
 0x497   :  { %v371_v61 = vpop.f32.mrb[0].mxu1 }
 0x498   :  { %v372_v62 = vadd.f32 %v418_v60, %v371_v61  ;;  %v486_v63 = vpop.f32.mrb[1].mxu1 }
 0x49a   :  { %v376_v0 = vmul.f32 0.01, %v372_v62  ;;  %vm375_vm6 = vcmp.gt.f32.partialorder %v372_v62, 0.0 }
 0x49c   :  { %v377_v1 = vsel %vm375_vm6, %v372_v62, %v376_v0 }
 0x49d   :  { %397 = vperm.xlu0 %518, %v377_v1   ;;  %379 = vrot.lane.b32.xlu1 %v377_v1, %s525_s27 }
 0x50f   :  { %v380_v2 = vpop.permute.xlu1 %379 }
 0x510   :  { %v383_v3 = vsel %vm382_vm7, %v380_v2, 0.0 }
 0x511   :  { %384 = vadd.xlane.f32.xlu1 %v383_v3 }
 0x51c   :  { %v398_v13 = vpop.permute.xlu0 %397 }
 0x59e   :  { %v385_v4 = vpop.xlane.xlu1 %384 }
 0x59f   :  { %v386_v5 = vrot.slane %v385_v4, 4 }
 0x5a1   :  { %v387_v6 = vadd.f32 %v386_v5, %v385_v4 }
 0x5a3   :  { %v388_v7 = vrot.slane %v387_v6, 2 }
 0x5a5   :  { %v389_v8 = vadd.f32 %v388_v7, %v387_v6 }
 0x5a7   :  { %v390_v9 = vrot.slane %v389_v8, 1 }
 0x5a9   :  { %v391_v10 = vadd.f32 %v390_v9, %v389_v8 }
 0x5ab   :  { %511 = vpush %v391_v10 }
 0x5dc   :  { %s512_s1 = spop %511 }
 0x5dd   :  { %s393_s28 = smul.f32 0.03125, %s512_s1 }
 0x5df   :  { %v394_v11 = vstv %s393_s28 }
 0x5e0   :  { %v395_v12 = vsub.f32 %v377_v1, %v394_v11 }
 0x5e2   :  { %v400_v14 = vadd.f32 %v398_v13, %v395_v12 }
 0x5e4   :  { %402 = vrot.lane.b32.xlu1 %v400_v14, %s525_s27 }
 0x656   :  { %v403_v15 = vpop.permute.xlu1 %402 }
 0x657   :  { %405 = vst.msk [vmem:[%s628_s2] sm:$0xff] %vm382_vm7, %v403_v15 }

</bundles_post_ra>
